<compile_context>
chip_gen: v7x
topology: tpu7x:2x2x1
jax: 0.10.0
libtpu: 0.0.40
codegen_flags: <defaults>
</compile_context>

<pallas_src>
import numpy as np
import jax
import jax.numpy as jnp
from jax.experimental import pallas as pl
from jax.experimental.pallas import tpu as pltpu

# Module-level constants referenced but not defined by the PyTorch source.
SPEC_NORM_GEN = False   # spectral norm only rescales weights; irrelevant for synthetic init
L_CONSTANT_GEN = 1.0

# CustomActivation constants
_SHIFT = 0.01
_VAL = float(np.log10(2.0))
_V0 = _VAL / 10.0
_ALPHA = _V0 * _SHIFT / (_VAL - _V0)

# Encoder dims: (27 feat + 10 img = 37) -> 32 -> 64 -> 64 -> 64 -> 128
K_FEAT = 27
K_IMG = 10
IN_DIM = K_FEAT + K_IMG          # 37
X_LANES = 64                     # merged input, zero-padded to 64 lanes
OUT_DIM = 128
LANES = 128

# ---- packed parameter slab layout (rows; every block start 8-row aligned) ----
R_W1 = 0        # 64-row block : rows 0..26 feat-part of W1, rows 27..36 img-part, cols 0..31 real
R_W2 = 64       # 128-row block: real (32, 64)
R_W3 = 192      # 128-row block: real (64, 64)
R_W4 = 320      # 128-row block: real (64, 64)
R_W5 = 448      # 128-row block: real (64, 128)
R_B = 576       # 8-row block  : rows 0..4 hold b1..b5 (lane-padded to 128)
SLAB_ROWS = 584  # 584 x 128 x 4B ~= 299 KiB total (single DMA, VMEM-resident)

TILE_B_MAX = 1024   # per-step VMEM ~1.5 MiB double-buffered; safe on v5e/v6e/v7x


def _round_up(n, m):
    return ((n + m - 1) // m) * m


def _elu(x, alpha):
    # safe-where: never evaluate exp on the large-positive (discarded) branch
    return jnp.where(x > 0, x, alpha * (jnp.exp(jnp.minimum(x, 0.0)) - 1.0))


def _custom_activation(x):
    # torch.where(x > shift, val + x - shift,
    #             v0 + ELU(alpha=v0*shift/(val-v0))(x) * (val - v0) / shift)
    return jnp.where(
        x > _SHIFT,
        _VAL + x - _SHIFT,
        _V0 + _elu(x, _ALPHA) * (_VAL - _V0) / _SHIFT,
    )


def generator_kernel(x_ref, slab_ref, out_ref):
    x = x_ref[...]                                         # (TILE_B, 64), lanes 37..63 zero

    # Static, 8-row-aligned slices of the resident VMEM slab.
    w1 = slab_ref[R_W1:R_W1 + X_LANES, :]                  # (64, 128)
    w2 = slab_ref[R_W2:R_W2 + LANES, :]                    # (128, 128)
    w3 = slab_ref[R_W3:R_W3 + LANES, :]
    w4 = slab_ref[R_W4:R_W4 + LANES, :]
    w5 = slab_ref[R_W5:R_W5 + LANES, :]
    b_all = slab_ref[R_B:R_B + 8, :]                       # one aligned (8, 128) load
    b1 = b_all[0:1, :]
    b2 = b_all[1:2, :]
    b3 = b_all[2:3, :]
    b4 = b_all[3:4, :]
    b5 = b_all[4:5, :]

    # Layer 1: merged (padded) input, single MXU push, then ELU(alpha=1).
    h = _elu(jnp.dot(x, w1, preferred_element_type=jnp.float32) + b1, 1.0)
    # Layers 2..4: lane-padded (TILE_B,128)@(128,128) + ELU; padded lanes stay 0.
    h = _elu(jnp.dot(h, w2, preferred_element_type=jnp.float32) + b2, 1.0)
    h = _elu(jnp.dot(h, w3, preferred_element_type=jnp.float32) + b3, 1.0)
    h = _elu(jnp.dot(h, w4, preferred_element_type=jnp.float32) + b4, 1.0)
    # Layer 5: Linear + CustomActivation, then L_CONSTANT_GEN scaling.
    h = jnp.dot(h, w5, preferred_element_type=jnp.float32) + b5
    out_ref[...] = L_CONSTANT_GEN * _custom_activation(h)


def init_params(key):
    """PyTorch nn.Linear default init: U(-1/sqrt(fan_in), 1/sqrt(fan_in))."""
    params = []
    fan_ins = [IN_DIM, 32, 64, 64, 64]
    fan_outs = [32, 64, 64, 64, 128]
    for fi, fo in zip(fan_ins, fan_outs):
        key, kw, kb = jax.random.split(key, 3)
        bound = 1.0 / np.sqrt(fi)
        w = jax.random.uniform(kw, (fi, fo), jnp.float32, -bound, bound)
        b = jax.random.uniform(kb, (fo,), jnp.float32, -bound, bound)
        params.append((w, b))
    return params


def pack_params(params):
    """Pack all weights/biases into one lane-dense (584, 128) f32 slab (done once)."""
    slab = np.zeros((SLAB_ROWS, LANES), np.float32)
    (w1, b1), (w2, b2), (w3, b3), (w4, b4), (w5, b5) = [
        (np.asarray(w), np.asarray(b)) for w, b in params
    ]
    # W1 rows: first 27 correspond to `features`, last 10 to `image` (cat order);
    # rows 37..63 and cols 32..127 stay zero (matches the zero-padded input lanes).
    slab[R_W1:R_W1 + IN_DIM, :32] = w1
    slab[R_W2:R_W2 + 32, :64] = w2
    slab[R_W3:R_W3 + 64, :64] = w3
    slab[R_W4:R_W4 + 64, :64] = w4
    slab[R_W5:R_W5 + 64, :128] = w5
    slab[R_B + 0, :32] = b1
    slab[R_B + 1, :64] = b2
    slab[R_B + 2, :64] = b3
    slab[R_B + 3, :64] = b4
    slab[R_B + 4, :128] = b5
    return jnp.asarray(slab)


@jax.jit
def generator_forward(features, image, slab):
    bs = features.shape[0]
    bs_pad = _round_up(bs, 8)
    tile_b = min(bs_pad, TILE_B_MAX)
    bs_pad = _round_up(bs_pad, tile_b)

    # One merged, lane-padded (zero) input: lanes 0..26 feat, 27..36 img, 37..63 zero.
    x = jnp.concatenate(
        (features.astype(jnp.float32), image.astype(jnp.float32)), axis=1)
    x = jnp.pad(x, ((0, bs_pad - bs), (0, X_LANES - IN_DIM)))

    flops_per_row = 2 * (IN_DIM * 32 + 32 * 64 + 64 * 64 + 64 * 64 + 64 * 128)
    cost = pl.CostEstimate(
        flops=bs_pad * flops_per_row,
        transcendentals=bs_pad * (32 + 64 + 64 + 64 + 128),
        bytes_accessed=(bs_pad * (X_LANES + OUT_DIM) + SLAB_ROWS * LANES) * 4,
    )

    out = pl.pallas_call(
        generator_kernel,
        out_shape=jax.ShapeDtypeStruct((bs_pad, OUT_DIM), jnp.float32),
        grid=(bs_pad // tile_b,),
        in_specs=[
            pl.BlockSpec((tile_b, X_LANES), lambda i: (i, 0)),      # merged input tile
            pl.BlockSpec((SLAB_ROWS, LANES), lambda i: (0, 0)),     # resident param slab
        ],
        out_specs=pl.BlockSpec((tile_b, OUT_DIM), lambda i: (i, 0)),
        compiler_params=pltpu.CompilerParams(
            dimension_semantics=("parallel",)),
        cost_estimate=cost,
    )(x, slab)
    return out[:bs].reshape((bs, 8, 16))


def reference_forward(features, image, params):
    """Pure-JAX reference with the exact (unpadded) math of the PyTorch module."""
    x = jnp.concatenate((features, image), axis=1)       # (bs, 37)
    h = x
    for i, (w, b) in enumerate(params):
        h = h @ w + b
        if i < 4:
            h = jnp.where(h > 0, h, jnp.exp(jnp.minimum(h, 0.0)) - 1.0)   # ELU(1.0)
        else:
            h = _custom_activation(h)
    return (L_CONSTANT_GEN * h).reshape((features.shape[0], 8, 16))


if __name__ == "__main__":
    key = jax.random.PRNGKey(0)
    kp, kf, ki = jax.random.split(key, 3)

    bs = 8
    k_feat = K_FEAT   # 27 feature dims
    n_img = K_IMG     # 10 image dims; 27 + 10 == 37 (encoder input size)

    params = init_params(kp)
    slab = pack_params(params)
    features = jax.random.normal(kf, (bs, k_feat), jnp.float32)
    image = jax.random.normal(ki, (bs, n_img), jnp.float32)

    out = jax.block_until_ready(generator_forward(features, image, slab))
    ref = reference_forward(features, image, params)

    assert out.shape == (bs, 8, 16)
    assert jnp.allclose(out, ref, atol=1e-5, rtol=1e-5), "mismatch vs reference"

    print("KERNEL_OK")
</pallas_src>

<mosaic_0001>
module attributes {stable_mosaic.version = 11 : i64} {
  func.func @generator_kernel(%arg0: i32, %arg1: memref<8x64xf32, #tpu.memory_space<vmem>>, %arg2: memref<584x128xf32, #tpu.memory_space<vmem>>, %arg3: memref<8x128xf32, #tpu.memory_space<vmem>>) attributes {dimension_semantics = [#tpu.dimension_semantics<parallel>], iteration_bounds = array<i64: 1>, scalar_prefetch = 0 : i64, scratch_operands = 0 : i64, tpu.core_type = #tpu.core_type<tc>, window_params = [{transform_indices = @transform_0, window_bounds = array<i64: 8, 64>}, {pipeline_mode = #tpu.pipeline_mode<synchronous>, transform_indices = @transform_1, window_bounds = array<i64: 584, 128>}, {transform_indices = @transform_2, window_bounds = array<i64: 8, 128>}]} {
    %c0 = arith.constant 0 : index
    %c0_0 = arith.constant 0 : index
    %0 = vector.load %arg1[%c0, %c0_0] : memref<8x64xf32, #tpu.memory_space<vmem>>, vector<8x64xf32>
    %c0_1 = arith.constant 0 : index
    %c0_2 = arith.constant 0 : index
    %1 = vector.load %arg2[%c0_1, %c0_2] : memref<584x128xf32, #tpu.memory_space<vmem>>, vector<64x128xf32>
    %c64 = arith.constant 64 : index
    %c0_3 = arith.constant 0 : index
    %2 = vector.load %arg2[%c64, %c0_3] : memref<584x128xf32, #tpu.memory_space<vmem>>, vector<128x128xf32>
    %c192 = arith.constant 192 : index
    %c0_4 = arith.constant 0 : index
    %3 = vector.load %arg2[%c192, %c0_4] : memref<584x128xf32, #tpu.memory_space<vmem>>, vector<128x128xf32>
    %c320 = arith.constant 320 : index
    %c0_5 = arith.constant 0 : index
    %4 = vector.load %arg2[%c320, %c0_5] : memref<584x128xf32, #tpu.memory_space<vmem>>, vector<128x128xf32>
    %c448 = arith.constant 448 : index
    %c0_6 = arith.constant 0 : index
    %5 = vector.load %arg2[%c448, %c0_6] : memref<584x128xf32, #tpu.memory_space<vmem>>, vector<128x128xf32>
    %c576 = arith.constant 576 : index
    %c0_7 = arith.constant 0 : index
    %6 = vector.load %arg2[%c576, %c0_7] : memref<584x128xf32, #tpu.memory_space<vmem>>, vector<8x128xf32>
    %7 = vector.extract_strided_slice %6 {offsets = [0, 0], sizes = [1, 128], strides = [1, 1]} : vector<8x128xf32> to vector<1x128xf32>
    %8 = vector.extract_strided_slice %6 {offsets = [1, 0], sizes = [1, 128], strides = [1, 1]} : vector<8x128xf32> to vector<1x128xf32>
    %9 = vector.extract_strided_slice %6 {offsets = [2, 0], sizes = [1, 128], strides = [1, 1]} : vector<8x128xf32> to vector<1x128xf32>
    %10 = vector.extract_strided_slice %6 {offsets = [3, 0], sizes = [1, 128], strides = [1, 1]} : vector<8x128xf32> to vector<1x128xf32>
    %11 = vector.extract_strided_slice %6 {offsets = [4, 0], sizes = [1, 128], strides = [1, 1]} : vector<8x128xf32> to vector<1x128xf32>
    %cst = arith.constant dense<0.000000e+00> : vector<8x128xf32>
    %12 = tpu.matmul %0, %1, %cst {dimension_numbers = #tpu.dot_dimension_numbers<[1], [0], [0], [1], [0, 0, 1, 1], [], []>} : vector<8x64xf32>, vector<64x128xf32>, vector<8x128xf32> -> vector<8x128xf32>
    %13 = vector.broadcast %7 : vector<1x128xf32> to vector<8x128xf32>
    %14 = arith.addf %12, %13 : vector<8x128xf32>
    %cst_8 = arith.constant 0.000000e+00 : f32
    %15 = vector.broadcast %cst_8 : f32 to vector<8x128xf32>
    %16 = arith.cmpf ogt, %14, %15 : vector<8x128xf32>
    %cst_9 = arith.constant 0.000000e+00 : f32
    %17 = vector.broadcast %cst_9 : f32 to vector<8x128xf32>
    %18 = arith.minimumf %14, %17 : vector<8x128xf32>
    %19 = math.exp %18 : vector<8x128xf32>
    %cst_10 = arith.constant 1.000000e+00 : f32
    %20 = vector.broadcast %cst_10 : f32 to vector<8x128xf32>
    %21 = arith.subf %19, %20 : vector<8x128xf32>
    %cst_11 = arith.constant 1.000000e+00 : f32
    %22 = vector.broadcast %cst_11 : f32 to vector<8x128xf32>
    %23 = arith.mulf %22, %21 : vector<8x128xf32>
    %24 = arith.select %16, %14, %23 : vector<8x128xi1>, vector<8x128xf32>
    %cst_12 = arith.constant dense<0.000000e+00> : vector<8x128xf32>
    %25 = tpu.matmul %24, %2, %cst_12 {dimension_numbers = #tpu.dot_dimension_numbers<[1], [0], [0], [1], [0, 0, 1, 1], [], []>} : vector<8x128xf32>, vector<128x128xf32>, vector<8x128xf32> -> vector<8x128xf32>
    %26 = vector.broadcast %8 : vector<1x128xf32> to vector<8x128xf32>
    %27 = arith.addf %25, %26 : vector<8x128xf32>
    %cst_13 = arith.constant 0.000000e+00 : f32
    %28 = vector.broadcast %cst_13 : f32 to vector<8x128xf32>
    %29 = arith.cmpf ogt, %27, %28 : vector<8x128xf32>
    %cst_14 = arith.constant 0.000000e+00 : f32
    %30 = vector.broadcast %cst_14 : f32 to vector<8x128xf32>
    %31 = arith.minimumf %27, %30 : vector<8x128xf32>
    %32 = math.exp %31 : vector<8x128xf32>
    %cst_15 = arith.constant 1.000000e+00 : f32
    %33 = vector.broadcast %cst_15 : f32 to vector<8x128xf32>
    %34 = arith.subf %32, %33 : vector<8x128xf32>
    %cst_16 = arith.constant 1.000000e+00 : f32
    %35 = vector.broadcast %cst_16 : f32 to vector<8x128xf32>
    %36 = arith.mulf %35, %34 : vector<8x128xf32>
    %37 = arith.select %29, %27, %36 : vector<8x128xi1>, vector<8x128xf32>
    %cst_17 = arith.constant dense<0.000000e+00> : vector<8x128xf32>
    %38 = tpu.matmul %37, %3, %cst_17 {dimension_numbers = #tpu.dot_dimension_numbers<[1], [0], [0], [1], [0, 0, 1, 1], [], []>} : vector<8x128xf32>, vector<128x128xf32>, vector<8x128xf32> -> vector<8x128xf32>
    %39 = vector.broadcast %9 : vector<1x128xf32> to vector<8x128xf32>
    %40 = arith.addf %38, %39 : vector<8x128xf32>
    %cst_18 = arith.constant 0.000000e+00 : f32
    %41 = vector.broadcast %cst_18 : f32 to vector<8x128xf32>
    %42 = arith.cmpf ogt, %40, %41 : vector<8x128xf32>
    %cst_19 = arith.constant 0.000000e+00 : f32
    %43 = vector.broadcast %cst_19 : f32 to vector<8x128xf32>
    %44 = arith.minimumf %40, %43 : vector<8x128xf32>
    %45 = math.exp %44 : vector<8x128xf32>
    %cst_20 = arith.constant 1.000000e+00 : f32
    %46 = vector.broadcast %cst_20 : f32 to vector<8x128xf32>
    %47 = arith.subf %45, %46 : vector<8x128xf32>
    %cst_21 = arith.constant 1.000000e+00 : f32
    %48 = vector.broadcast %cst_21 : f32 to vector<8x128xf32>
    %49 = arith.mulf %48, %47 : vector<8x128xf32>
    %50 = arith.select %42, %40, %49 : vector<8x128xi1>, vector<8x128xf32>
    %cst_22 = arith.constant dense<0.000000e+00> : vector<8x128xf32>
    %51 = tpu.matmul %50, %4, %cst_22 {dimension_numbers = #tpu.dot_dimension_numbers<[1], [0], [0], [1], [0, 0, 1, 1], [], []>} : vector<8x128xf32>, vector<128x128xf32>, vector<8x128xf32> -> vector<8x128xf32>
    %52 = vector.broadcast %10 : vector<1x128xf32> to vector<8x128xf32>
    %53 = arith.addf %51, %52 : vector<8x128xf32>
    %cst_23 = arith.constant 0.000000e+00 : f32
    %54 = vector.broadcast %cst_23 : f32 to vector<8x128xf32>
    %55 = arith.cmpf ogt, %53, %54 : vector<8x128xf32>
    %cst_24 = arith.constant 0.000000e+00 : f32
    %56 = vector.broadcast %cst_24 : f32 to vector<8x128xf32>
    %57 = arith.minimumf %53, %56 : vector<8x128xf32>
    %58 = math.exp %57 : vector<8x128xf32>
    %cst_25 = arith.constant 1.000000e+00 : f32
    %59 = vector.broadcast %cst_25 : f32 to vector<8x128xf32>
    %60 = arith.subf %58, %59 : vector<8x128xf32>
    %cst_26 = arith.constant 1.000000e+00 : f32
    %61 = vector.broadcast %cst_26 : f32 to vector<8x128xf32>
    %62 = arith.mulf %61, %60 : vector<8x128xf32>
    %63 = arith.select %55, %53, %62 : vector<8x128xi1>, vector<8x128xf32>
    %cst_27 = arith.constant dense<0.000000e+00> : vector<8x128xf32>
    %64 = tpu.matmul %63, %5, %cst_27 {dimension_numbers = #tpu.dot_dimension_numbers<[1], [0], [0], [1], [0, 0, 1, 1], [], []>} : vector<8x128xf32>, vector<128x128xf32>, vector<8x128xf32> -> vector<8x128xf32>
    %65 = vector.broadcast %11 : vector<1x128xf32> to vector<8x128xf32>
    %66 = arith.addf %64, %65 : vector<8x128xf32>
    %cst_28 = arith.constant 0.00999999977 : f32
    %67 = vector.broadcast %cst_28 : f32 to vector<8x128xf32>
    %68 = arith.cmpf ogt, %66, %67 : vector<8x128xf32>
    %cst_29 = arith.constant 3.010300e-01 : f32
    %69 = vector.broadcast %cst_29 : f32 to vector<8x128xf32>
    %70 = arith.addf %69, %66 : vector<8x128xf32>
    %cst_30 = arith.constant 0.00999999977 : f32
    %71 = vector.broadcast %cst_30 : f32 to vector<8x128xf32>
    %72 = arith.subf %70, %71 : vector<8x128xf32>
    %cst_31 = arith.constant 0.000000e+00 : f32
    %73 = vector.broadcast %cst_31 : f32 to vector<8x128xf32>
    %74 = arith.cmpf ogt, %66, %73 : vector<8x128xf32>
    %cst_32 = arith.constant 0.000000e+00 : f32
    %75 = vector.broadcast %cst_32 : f32 to vector<8x128xf32>
    %76 = arith.minimumf %66, %75 : vector<8x128xf32>
    %77 = math.exp %76 : vector<8x128xf32>
    %cst_33 = arith.constant 1.000000e+00 : f32
    %78 = vector.broadcast %cst_33 : f32 to vector<8x128xf32>
    %79 = arith.subf %77, %78 : vector<8x128xf32>
    %cst_34 = arith.constant 0.00111111114 : f32
    %80 = vector.broadcast %cst_34 : f32 to vector<8x128xf32>
    %81 = arith.mulf %80, %79 : vector<8x128xf32>
    %82 = arith.select %74, %66, %81 : vector<8x128xi1>, vector<8x128xf32>
    %cst_35 = arith.constant 0.270926982 : f32
    %83 = vector.broadcast %cst_35 : f32 to vector<8x128xf32>
    %84 = arith.mulf %82, %83 : vector<8x128xf32>
    %cst_36 = arith.constant 0.00999999977 : f32
    %85 = vector.broadcast %cst_36 : f32 to vector<8x128xf32>
    %86 = arith.divf %84, %85 : vector<8x128xf32>
    %cst_37 = arith.constant 3.010300e-02 : f32
    %87 = vector.broadcast %cst_37 : f32 to vector<8x128xf32>
    %88 = arith.addf %87, %86 : vector<8x128xf32>
    %89 = arith.select %68, %72, %88 : vector<8x128xi1>, vector<8x128xf32>
    %cst_38 = arith.constant 1.000000e+00 : f32
    %90 = vector.broadcast %cst_38 : f32 to vector<8x128xf32>
    %91 = arith.mulf %90, %89 : vector<8x128xf32>
    %c0_39 = arith.constant 0 : index
    %c0_40 = arith.constant 0 : index
    %92 = vector.load %arg3[%c0_39, %c0_40] : memref<8x128xf32, #tpu.memory_space<vmem>>, vector<8x128xf32>
    tpu.vector_store %arg3[%c0_39, %c0_40], %91 {strides = array<i32>} : memref<8x128xf32, #tpu.memory_space<vmem>>, vector<8x128xf32>,
    return
  }
  func.func @transform_0(%arg0: i32) -> (i32, i32) {
    %c0_i32 = arith.constant 0 : i32
    %c0_i32_0 = arith.constant 0 : i32
    return %arg0, %c0_i32 : i32, i32
  }
  func.func @transform_1(%arg0: i32) -> (i32, i32) {
    %c0_i32 = arith.constant 0 : i32
    %c0_i32_0 = arith.constant 0 : i32
    %c0_i32_1 = arith.constant 0 : i32
    return %c0_i32, %c0_i32_0 : i32, i32
  }
  func.func @transform_2(%arg0: i32) -> (i32, i32) {
    %c0_i32 = arith.constant 0 : i32
    %c0_i32_0 = arith.constant 0 : i32
    return %arg0, %c0_i32 : i32, i32
  }
}

</mosaic_0001>

<bundles_post_ra>
// kernel: generator_forward.1
= control target key start
LH: loop header
LB: loop body
LE: loop exit
PB: predicated region body
PF: predicated region fallthrough
CT: control target
= control target key end

     0   :  { %7 = vsyncpa [#allocation3], 0  ;;  %s909_s9 = smov [#allocation2]   ;;  %s1008_s0 = inlined_call_operand.vmem [shape: f32[8,64], index: 0, kind: input, shape index: {}]   ;;  %s1009_s1 = inlined_call_operand.hbm [shape: f32[584,128], index: 1, kind: input, shape index: {}]   ;;  %s1010_s2 = inlined_call_operand.vmem [shape: f32[8,128], index: 2, kind: output, shape index: {}]  }
   0x1   :  { %s15_s10 = sshll.u32 %s909_s9, 4  ;;  %s885_s13 = scalar_lea.hbm %s1009_s1, 9344  ;;  %s16_s10 = int_to_ptr.vmem [resolvable:$true] %s15_s10 }
   0x2   :  { %p886_p0 = scmp.ne.s32.totalorder %s1009_s1, %s885_s13  ;;  %p889_p1 = scmp.lt.u32.totalorder %s885_s13, %s1009_s1 }
   0x4   :  { %p891_p2 = pnand %p889_p1, %p886_p0 }
   0x6   :  { %894 = shalt.err (!%p891_p2)
}
   0x7   :  { %s895_s18 = scalar_lea.vmem %s16_s10, 9344  ;;  %p900_p4 = scmp.lt.s32.totalorder %s16_s10, %s16_s10 }
   0x8   :  { %p896_p3 = scmp.ne.s32.totalorder %s16_s10, %s895_s18  ;;  %p901_p5 = scmp.lt.s32.totalorder %s895_s18, %s895_s18 }
   0xa   :  { %p902_p6 = por %p901_p5, %p900_p4 }
   0xc   :  { %p903_p7 = pnand %p902_p6, %p896_p3 }
   0xe   :  { %906 = shalt.err (!%p903_p7)
}
   0xf   :  { %s910_s19 = smov 128   ;;  %s911_s20 = smov 8  }
  0x10   :  { %21 = dma.hbm_to_vmem [thread:$0]  %s1009_s1, 9344, %s16_s10, [#allocation3], %s910_s19, %s910_s19, %s911_s20  }
  0x11   :  { %907 = dma.done.wait [#allocation3], 9344  }
  0x12   :  { %908 = vsyncadd [#allocation3], 4294957952  ;;  %v912_v0 = vmov 0.0|0.0   ;;  %vm913_vm0 = vmmov 0   ;;  %v914_v1 = vmov 0.0   ;;  %v26_v2 = vld [vmem:[#allocation2] sm:$0xff]  ;;  %v99_v48 = vlaneseq }
  0x13   :  { %761 = vmatprep.subr.bf16.mxu0 %v912_v0  ;;  %618 = vmatprep.mubr.msk.f32.mxu0 %vm913_vm0, %v914_v1  ;;  %v27_v3 = vld [vmem:[#allocation2 + $0x8] sm:$0xff]  ;;  %v28_v4 = vld [vmem:[#allocation2 + $0x10] sm:$0xff]  ;;  %v29_v6 = vld [vmem:[#allocation2 + $0x18] sm:$0xff]  ;;  %vm103_vm1 = vcmask 523264  }
  0x14   :  { %773 = vmatprep.subr.bf16.mxu1 %v912_v0  ;;  %653 = vmatprep.mubr.msk.f32.mxu1 %vm913_vm0, %v914_v1  ;;  %v762_v5 = vpack.c.bf16 %v27_v3, %v26_v2  ;;  %v765_v7 = vpack.c.bf16 %v29_v6, %v28_v4  ;;  %v34_v8 = vld [vmem:[#allocation2 + $0x40] sm:$0xff]  ;;  %v35_v9 = vld [vmem:[#allocation2 + $0x48] sm:$0xff]  ;;  %v36_v10 = vld [vmem:[#allocation2 + $0x50] sm:$0xff]  ;;  %v968_v49 = vshrl.u32 %v99_v48, 7 }
  0x15   :  { %v30_v11 = vld [vmem:[#allocation2 + $0x20] sm:$0xff]  ;;  %v31_v12 = vld [vmem:[#allocation2 + $0x28] sm:$0xff]  ;;  %v774_v13 = vpack.c.bf16 %v35_v9, %v34_v8  ;;  %v37_v14 = vld [vmem:[#allocation2 + $0x58] sm:$0xff] }
  0x16   :  { %763 = vmatpush3.bf16.msra.mxu0 %v762_v5  ;;  %v777_v15 = vpack.c.bf16 %v37_v14, %v36_v10  ;;  %v768_v16 = vpack.c.bf16 %v31_v12, %v30_v11  ;;  %v38_v17 = vld [vmem:[#allocation2 + $0x60] sm:$0xff]  ;;  %v39_v18 = vld [vmem:[#allocation2 + $0x68] sm:$0xff]  ;;  %v32_v19 = vld [vmem:[#allocation2 + $0x30] sm:$0xff]  ;;  %v101_v50 = vsub.s32 0, %v968_v49 }
  0x17   :  { %764 = vmatprep.subr.bf16.mxu0 %v912_v0  ;;  %775 = vmatpush3.bf16.msra.mxu1 %v774_v13  ;;  %v33_v20 = vld [vmem:[#allocation2 + $0x38] sm:$0xff]  ;;  %v780_v21 = vpack.c.bf16 %v39_v18, %v38_v17  ;;  %v25_v23 = vld [vmem:[%s1008_s0] sm:$0xff]  ;;  %v40_v24 = vld [vmem:[#allocation2 + $0x70] sm:$0xff] }
  0x18   :  { %776 = vmatprep.subr.bf16.mxu1 %v912_v0  ;;  %v771_v22 = vpack.c.bf16 %v33_v20, %v32_v19  ;;  %v41_v25 = vld [vmem:[#allocation2 + $0x78] sm:$0xff]  ;;  %v42_v27 = vld [vmem:[#allocation2 + $0x80] sm:$0xff]  ;;  %v43_v28 = vld [vmem:[#allocation2 + $0x88] sm:$0xff] }
  0x19   :  { %v783_v26 = vpack.c.bf16 %v41_v25, %v40_v24  ;;  %v786_v29 = vpack.c.bf16 %v43_v28, %v42_v27  ;;  %v44_v30 = vld [vmem:[#allocation2 + $0x90] sm:$0xff]  ;;  %v45_v31 = vld [vmem:[#allocation2 + $0x98] sm:$0xff]  ;;  %v46_v32 = vld [vmem:[#allocation2 + $0xa0] sm:$0xff] }
  0x1a   :  { %766 = vmatpush3.bf16.msra.mxu0 %v765_v7  ;;  %v789_v33 = vpack.c.bf16 %v45_v31, %v44_v30  ;;  %v47_v34 = vld [vmem:[#allocation2 + $0xa8] sm:$0xff]  ;;  %v48_v36 = vld [vmem:[#allocation2 + $0xb0] sm:$0xff]  ;;  %v49_v37 = vld [vmem:[#allocation2 + $0xb8] sm:$0xff] }
  0x1b   :  { %767 = vmatprep.subr.bf16.mxu0 %v912_v0  ;;  %778 = vmatpush3.bf16.msra.mxu1 %v777_v15  ;;  %v792_v35 = vpack.c.bf16 %v47_v34, %v46_v32  ;;  %v795_v38 = vpack.c.bf16 %v49_v37, %v48_v36  ;;  %v50_v39 = vld [vmem:[#allocation2 + $0xc0] sm:$0xff]  ;;  %v51_v40 = vld [vmem:[#allocation2 + $0xc8] sm:$0xff]  ;;  %v52_v41 = vld [vmem:[#allocation2 + $0xd0] sm:$0xff] }
  0x1c   :  { %779 = vmatprep.subr.bf16.mxu1 %v912_v0  ;;  %v798_v42 = vpack.c.bf16 %v51_v40, %v50_v39  ;;  %v53_v43 = vld [vmem:[#allocation2 + $0xd8] sm:$0xff]  ;;  %v54_v45 = vld [vmem:[#allocation2 + $0xe0] sm:$0xff]  ;;  %v55_v46 = vld [vmem:[#allocation2 + $0xe8] sm:$0xff] }
  0x1d   :  { %v801_v44 = vpack.c.bf16 %v53_v43, %v52_v41  ;;  %v804_v47 = vpack.c.bf16 %v55_v46, %v54_v45  ;;  %v971_v51 = vld [vmem:[#allocation2 + $0x240] sm:$0xff]  ;;  %v56_v61 = vld [vmem:[#allocation2 + $0xf0] sm:$0xff]  ;;  %v57_v62 = vld [vmem:[#allocation2 + $0xf8] sm:$0xff] }
  0x1e   :  { %769 = vmatpush3.bf16.msra.mxu0 %v768_v16  ;;  %v102_v52 = vrot.slane %v971_v51, %v101_v50  ;;  %v807_v63 = vpack.c.bf16 %v57_v62, %v56_v61  ;;  %v58_v2 = vld [vmem:[#allocation2 + $0x100] sm:$0xff]  ;;  %v59_v3 = vld [vmem:[#allocation2 + $0x108] sm:$0xff]  ;;  %v60_v5 = vld [vmem:[#allocation2 + $0x110] sm:$0xff] }
  0x1f   :  { %770 = vmatprep.subr.bf16.mxu0 %v912_v0  ;;  %781 = vmatpush3.bf16.msra.mxu1 %v780_v21  ;;  %v810_v4 = vpack.c.bf16 %v59_v3, %v58_v2  ;;  %v61_v6 = vld [vmem:[#allocation2 + $0x118] sm:$0xff]  ;;  %v62_v7 = vld [vmem:[#allocation2 + $0x120] sm:$0xff]  ;;  %v63_v9 = vld [vmem:[#allocation2 + $0x128] sm:$0xff] }
  0x20   :  { %782 = vmatprep.subr.bf16.mxu1 %v912_v0  ;;  %v813_v8 = vpack.c.bf16 %v61_v6, %v60_v5  ;;  %v816_v10 = vpack.c.bf16 %v63_v9, %v62_v7  ;;  %v64_v11 = vld [vmem:[#allocation2 + $0x130] sm:$0xff]  ;;  %v65_v12 = vld [vmem:[#allocation2 + $0x138] sm:$0xff]  ;;  %v66_v14 = vld [vmem:[#allocation2 + $0x140] sm:$0xff] }
  0x21   :  { %v819_v13 = vpack.c.bf16 %v65_v12, %v64_v11  ;;  %v67_v15 = vld [vmem:[#allocation2 + $0x148] sm:$0xff]  ;;  %v68_v16 = vld [vmem:[#allocation2 + $0x150] sm:$0xff]  ;;  %v69_v18 = vld [vmem:[#allocation2 + $0x158] sm:$0xff] }
  0x22   :  { %772 = vmatpush3.bf16.msra.mxu0 %v771_v22  ;;  %v822_v17 = vpack.c.bf16 %v67_v15, %v66_v14  ;;  %v825_v19 = vpack.c.bf16 %v69_v18, %v68_v16  ;;  %v70_v20 = vld [vmem:[#allocation2 + $0x160] sm:$0xff]  ;;  %v71_v21 = vld [vmem:[#allocation2 + $0x168] sm:$0xff]  ;;  %v73_v34 = vld [vmem:[#allocation2 + $0x178] sm:$0xff] }
  0x23   :  { %797 = vmatprep.subr.bf16.mxu0 %v912_v0  ;;  %784 = vmatpush3.bf16.msra.mxu1 %v783_v26  ;;  %v828_v22 = vpack.c.bf16 %v71_v21, %v70_v20  ;;  %v74_v36 = vld [vmem:[#allocation2 + $0x180] sm:$0xff]  ;;  %v75_v37 = vld [vmem:[#allocation2 + $0x188] sm:$0xff]  ;;  %v76_v39 = vld [vmem:[#allocation2 + $0x190] sm:$0xff]  ;;  %v345_v21 = vsub.s32 3, %v968_v49 }
  0x24   :  { %785 = vmatprep.subr.bf16.mxu1 %v912_v0  ;;  %v77_v40 = vld [vmem:[#allocation2 + $0x198] sm:$0xff]  ;;  %v78_v41 = vld [vmem:[#allocation2 + $0x1a0] sm:$0xff]  ;;  %v79_v43 = vld [vmem:[#allocation2 + $0x1a8] sm:$0xff] }
  0x25   :  { %619 = vmatmul.mubr.msk.f32.vlgmr.msra.gmra.mrb[0].mxu0 %vm103_vm1, %v25_v23  ;;  %v185_v23 = vsub.s32 1, %v968_v49  ;;  %v81_v45 = vld [vmem:[#allocation2 + $0x1b8] sm:$0xff]  ;;  %v83_v48 = vld [vmem:[#allocation2 + $0x1c8] sm:$0xff]  ;;  %v84_v50 = vld [vmem:[#allocation2 + $0x1d0] sm:$0xff] }
  0x26   :  { %688 = vmatprep.mubr.msk.f32.mxu0 %vm913_vm0, %v914_v1  ;;  %799 = vmatpush3.bf16.msra.mxu0 %v798_v42  ;;  %v837_v42 = vpack.c.bf16 %v77_v40, %v76_v39  ;;  %v88_v6 = vld [vmem:[#allocation2 + $0x1f0] sm:$0xff]  ;;  %v89_v7 = vld [vmem:[#allocation2 + $0x1f8] sm:$0xff]  ;;  %v90_v9 = vld [vmem:[#allocation2 + $0x200] sm:$0xff] }
  0x27   :  { %787 = vmatpush3.bf16.msra.mxu1 %v786_v29  ;;  %800 = vmatprep.subr.bf16.mxu0 %v912_v0  ;;  %v186_v24 = vrot.slane %v971_v51, %v185_v23  ;;  %v92_v12 = vld [vmem:[#allocation2 + $0x210] sm:$0xff]  ;;  %v94_v14 = vld [vmem:[#allocation2 + $0x220] sm:$0xff]  ;;  %v95_v16 = vld [vmem:[#allocation2 + $0x228] sm:$0xff] }
  0x28   :  { %788 = vmatprep.subr.bf16.mxu1 %v912_v0  ;;  %v96_v18 = vld [vmem:[#allocation2 + $0x230] sm:$0xff] }
  0x2a   :  { %802 = vmatpush3.bf16.msra.mxu0 %v801_v44  ;;  %v840_v44 = vpack.c.bf16 %v79_v43, %v78_v41 }
  0x2b   :  { %790 = vmatpush3.bf16.msra.mxu1 %v789_v33  ;;  %803 = vmatprep.subr.bf16.mxu0 %v912_v0  ;;  %v72_v33 = vld [vmem:[#allocation2 + $0x170] sm:$0xff] }
  0x2c   :  { %791 = vmatprep.subr.bf16.mxu1 %v912_v0 }
  0x2e   :  { %805 = vmatpush3.bf16.msra.mxu0 %v804_v47  ;;  %v82_v47 = vld [vmem:[#allocation2 + $0x1c0] sm:$0xff] }
  0x2f   :  { %793 = vmatpush3.bf16.msra.mxu1 %v792_v35  ;;  %806 = vmatprep.subr.bf16.mxu0 %v912_v0  ;;  %v831_v35 = vpack.c.bf16 %v73_v34, %v72_v33 }
  0x30   :  { %794 = vmatprep.subr.bf16.mxu1 %v912_v0 }
  0x32   :  { %808 = vmatpush3.bf16.msra.mxu0 %v807_v63 }
  0x33   :  { %796 = vmatpush3.bf16.msra.mxu1 %v795_v38  ;;  %809 = vmatprep.subr.bf16.mxu0 %v912_v0  ;;  %v834_v38 = vpack.c.bf16 %v75_v37, %v74_v36 }
  0x34   :  { %821 = vmatprep.subr.bf16.mxu1 %v912_v0 }
  0x36   :  { %811 = vmatpush3.bf16.msra.mxu0 %v810_v4 }
  0x37   :  { %812 = vmatprep.subr.bf16.mxu0 %v912_v0 }
  0x3a   :  { %814 = vmatpush3.bf16.msra.mxu0 %v813_v8  ;;  %v855_v8 = vpack.c.bf16 %v89_v7, %v88_v6 }
  0x3b   :  { %815 = vmatprep.subr.bf16.mxu0 %v912_v0 }
  0x3e   :  { %817 = vmatpush3.bf16.msra.mxu0 %v816_v10  ;;  %v91_v10 = vld [vmem:[#allocation2 + $0x208] sm:$0xff] }
  0x3f   :  { %818 = vmatprep.subr.bf16.mxu0 %v912_v0  ;;  %v858_v11 = vpack.c.bf16 %v91_v10, %v90_v9 }
  0x42   :  { %820 = vmatpush3.bf16.msra.mxu0 %v819_v13  ;;  %v93_v13 = vld [vmem:[#allocation2 + $0x218] sm:$0xff] }
  0x43   :  { %845 = vmatprep.subr.bf16.mxu0 %v912_v0  ;;  %v861_v15 = vpack.c.bf16 %v93_v13, %v92_v12 }
  0xf8   :  { %v173_v53 = vpop.f32.mrb[0].mxu0 }
  0xf9   :  { %v174_v54 = vadd.f32 %v173_v53, %v102_v52  ;;  %v620_v55 = vpop.f32.mrb[1].mxu0  ;;  %v846_v52 = vpack.c.bf16 %v83_v48, %v82_v47  ;;  %v85_v53 = vld [vmem:[#allocation2 + $0x1d8] sm:$0xff] }
  0xfa   :  { %v86_v55 = vld [vmem:[#allocation2 + $0x1e0] sm:$0xff] }
  0xfb   :  { %v178_v56 = vmin.f32 %v174_v54, 0.0  ;;  %vm177_vm2 = vcmp.gt.f32.partialorder %v174_v54, 0.0 }
  0xfd   :  { %v179_v57 = vmul.f32 1.442695, %v178_v56  ;;  %v87_v56 = vld [vmem:[#allocation2 + $0x1e8] sm:$0xff] }
  0xff   :  { %875 = vpow2.f32 %v179_v57  ;;  %v852_v57 = vpack.c.bf16 %v87_v56, %v86_v55 }
 0x109   :  { %v876_v58 = vpop.eup %875 }
 0x10a   :  { %v519_v59 = vadd.f32 -1.0, %v876_v58  ;;  %v265_v58 = vsub.s32 2, %v968_v49 }
 0x10c   :  { %v182_v60 = vsel %vm177_vm2, %v174_v54, %v519_v59  ;;  %v849_v54 = vpack.c.bf16 %v85_v53, %v84_v50  ;;  %v266_v59 = vrot.slane %v971_v51, %v265_v58 }
 0x10d   :  { %654 = vmatmul.mubr.f32.vlgmr.msra.gmra.mrb[0].mxu1 %v182_v60 }
 0x10e   :  { %723 = vmatprep.mubr.msk.f32.mxu1 %vm913_vm0, %v914_v1  ;;  %823 = vmatpush3.bf16.msra.mxu1 %v822_v17  ;;  %v864_v17 = vpack.c.bf16 %v95_v16, %v94_v14 }
 0x10f   :  { %824 = vmatprep.subr.bf16.mxu1 %v912_v0 }
 0x112   :  { %826 = vmatpush3.bf16.msra.mxu1 %v825_v19  ;;  %v97_v19 = vld [vmem:[#allocation2 + $0x238] sm:$0xff] }
 0x113   :  { %827 = vmatprep.subr.bf16.mxu1 %v912_v0  ;;  %v867_v20 = vpack.c.bf16 %v97_v19, %v96_v18 }
 0x116   :  { %829 = vmatpush3.bf16.msra.mxu1 %v828_v22  ;;  %v346_v22 = vrot.slane %v971_v51, %v345_v21 }
 0x117   :  { %830 = vmatprep.subr.bf16.mxu1 %v912_v0 }
 0x11a   :  { %832 = vmatpush3.bf16.msra.mxu1 %v831_v35 }
 0x11b   :  { %833 = vmatprep.subr.bf16.mxu1 %v912_v0 }
 0x11e   :  { %835 = vmatpush3.bf16.msra.mxu1 %v834_v38 }
 0x11f   :  { %836 = vmatprep.subr.bf16.mxu1 %v912_v0 }
 0x122   :  { %838 = vmatpush3.bf16.msra.mxu1 %v837_v42 }
 0x123   :  { %839 = vmatprep.subr.bf16.mxu1 %v912_v0 }
 0x126   :  { %841 = vmatpush3.bf16.msra.mxu1 %v840_v44 }
 0x127   :  { %842 = vmatprep.subr.bf16.mxu1 %v912_v0 }
 0x1e0   :  { %v253_v25 = vpop.f32.mrb[0].mxu1 }
 0x1e1   :  { %v254_v26 = vadd.f32 %v253_v25, %v186_v24  ;;  %v655_v27 = vpop.f32.mrb[1].mxu1 }
 0x1e3   :  { %v258_v28 = vmin.f32 %v254_v26, 0.0  ;;  %vm257_vm3 = vcmp.gt.f32.partialorder %v254_v26, 0.0 }
 0x1e5   :  { %v259_v29 = vmul.f32 1.442695, %v258_v28 }
 0x1e7   :  { %877 = vpow2.f32 %v259_v29 }
 0x1f1   :  { %v878_v30 = vpop.eup %877 }
 0x1f2   :  { %v520_v31 = vadd.f32 -1.0, %v878_v30 }
 0x1f4   :  { %v262_v32 = vsel %vm257_vm3, %v254_v26, %v520_v31  ;;  %v425_v31 = vsub.s32 4, %v968_v49 }
 0x1f5   :  { %689 = vmatmul.mubr.f32.vlgmr.msra.gmra.mrb[2].mxu0 %v262_v32 }
 0x1f6   :  { %758 = vmatprep.mubr.msk.f32.mxu0 %vm913_vm0, %v914_v1  ;;  %v80_v1 = vld [vmem:[#allocation2 + $0x1b0] sm:$0xff]  ;;  %847 = vmatpush3.bf16.msra.mxu0 %v846_v52 }
 0x1f7   :  { %v843_v46 = vpack.c.bf16 %v81_v45, %v80_v1  ;;  %848 = vmatprep.subr.bf16.mxu0 %v912_v0 }
 0x1f9   :  { %844 = vmatpush3.bf16.msra.mxu1 %v843_v46 }
 0x1fa   :  { %850 = vmatpush3.bf16.msra.mxu0 %v849_v54 }
 0x1fb   :  { %851 = vmatprep.subr.bf16.mxu0 %v912_v0 }
 0x1fe   :  { %853 = vmatpush3.bf16.msra.mxu0 %v852_v57 }
 0x1ff   :  { %854 = vmatprep.subr.bf16.mxu0 %v912_v0 }
 0x202   :  { %856 = vmatpush3.bf16.msra.mxu0 %v855_v8 }
 0x203   :  { %857 = vmatprep.subr.bf16.mxu0 %v912_v0 }
 0x206   :  { %859 = vmatpush3.bf16.msra.mxu0 %v858_v11 }
 0x207   :  { %860 = vmatprep.subr.bf16.mxu0 %v912_v0 }
 0x20a   :  { %862 = vmatpush3.bf16.msra.mxu0 %v861_v15 }
 0x20b   :  { %863 = vmatprep.subr.bf16.mxu0 %v912_v0 }
 0x20e   :  { %865 = vmatpush3.bf16.msra.mxu0 %v864_v17 }
 0x20f   :  { %866 = vmatprep.subr.bf16.mxu0 %v912_v0  ;;  %v426_v0 = vrot.slane %v971_v51, %v425_v31 }
 0x212   :  { %868 = vmatpush3.bf16.msra.mxu0 %v867_v20 }
 0x2c8   :  { %v333_v60 = vpop.f32.mrb[2].mxu0 }
 0x2c9   :  { %v334_v61 = vadd.f32 %v333_v60, %v266_v59  ;;  %v690_v62 = vpop.f32.mrb[3].mxu0 }
 0x2cb   :  { %v338_v63 = vmin.f32 %v334_v61, 0.0  ;;  %vm337_vm4 = vcmp.gt.f32.partialorder %v334_v61, 0.0 }
 0x2cd   :  { %v339_v2 = vmul.f32 1.442695, %v338_v63 }
 0x2cf   :  { %879 = vpow2.f32 %v339_v2 }
 0x2d9   :  { %v880_v3 = vpop.eup %879 }
 0x2da   :  { %v521_v4 = vadd.f32 -1.0, %v880_v3 }
 0x2dc   :  { %v342_v5 = vsel %vm337_vm4, %v334_v61, %v521_v4 }
 0x2dd   :  { %724 = vmatmul.mubr.f32.vlgmr.msra.gmra.mrb[2].mxu1 %v342_v5 }
 0x3b0   :  { %v413_v23 = vpop.f32.mrb[2].mxu1 }
 0x3b1   :  { %v414_v24 = vadd.f32 %v413_v23, %v346_v22  ;;  %v725_v25 = vpop.f32.mrb[3].mxu1 }
 0x3b3   :  { %v418_v26 = vmin.f32 %v414_v24, 0.0  ;;  %vm417_vm5 = vcmp.gt.f32.partialorder %v414_v24, 0.0 }
 0x3b5   :  { %v419_v27 = vmul.f32 1.442695, %v418_v26 }
 0x3b7   :  { %881 = vpow2.f32 %v419_v27 }
 0x3c1   :  { %v882_v28 = vpop.eup %881 }
 0x3c2   :  { %v522_v29 = vadd.f32 -1.0, %v882_v28 }
 0x3c4   :  { %v422_v30 = vsel %vm417_vm5, %v414_v24, %v522_v29 }
 0x3c5   :  { %759 = vmatmul.mubr.f32.vlgmr.msra.gmra.mrb[4].mxu0 %v422_v30 }
 0x498   :  { %v493_v32 = vpop.f32.mrb[4].mxu0 }
 0x499   :  { %v494_v33 = vadd.f32 %v493_v32, %v426_v0  ;;  %v760_v34 = vpop.f32.mrb[5].mxu0 }
 0x49b   :  { %v501_v35 = vmin.f32 %v494_v33, 0.0  ;;  %vm500_vm6 = vcmp.gt.f32.partialorder %v494_v33, 0.0  ;;  %v498_v41 = vadd.f32 0.30103, %v494_v33  ;;  %vm497_vm7 = vcmp.gt.f32.partialorder %v494_v33, 0.01 }
 0x49d   :  { %v502_v36 = vmul.f32 1.442695, %v501_v35  ;;  %v523_v44 = vadd.f32 -0.01, %v498_v41 }
 0x49f   :  { %883 = vpow2.f32 %v502_v36 }
 0x4a9   :  { %v884_v37 = vpop.eup %883 }
 0x4aa   :  { %v524_v38 = vadd.f32 -1.0, %v884_v37 }
 0x4ac   :  { %v505_v39 = vmul.f32 0.0011111111, %v524_v38 }
 0x4ae   :  { %v506_v40 = vsel %vm500_vm6, %v494_v33, %v505_v39 }
 0x4af   :  { %v507_v42 = vmul.f32 0.27092698, %v506_v40 }
 0x4b1   :  { %v509_v43 = vmul.f32 100.0, %v507_v42 }
 0x4b3   :  { %v510_v1 = vadd.f32 0.030103, %v509_v43 }
 0x4b5   :  { %v511_v49 = vsel %vm497_vm7, %v523_v44, %v510_v1 }
 0x4b6   :  { %512 = vst [vmem:[%s1010_s2] sm:$0xff] %v511_v49 }
 0x4b7   :  { %517 = vsyncpa [#allocation3], 1 }

</bundles_post_ra>
